<compile_context>
chip_gen: v6e
topology: v6e:2x2x1
jax: 0.10.0
libtpu: 0.0.40
codegen_flags: <defaults>
</compile_context>

<pallas_src>
import jax
import jax.numpy as jnp
from jax.experimental import pallas as pl
from jax.experimental.pallas import tpu as pltpu


# ----------------------------------------------------------------------------
# Pallas kernel: one tile of Bt batch elements per grid step
# ----------------------------------------------------------------------------
def decoder_attn_kernel(
    embed_ref,    # (Bt, E)
    h_ref,        # (Bt, H)          prev decoder hidden
    enc_ref,      # (Bt, S, He)      encoder outputs
    w_attn_ref,   # (H + He, H)      rows [0:H] -> hidden, [H:H+He] -> enc
    b_attn_ref,   # (1, H)
    v_ref,        # (1, H)           attention score vector (row)
    w_ih_ref,     # (E + He, 3H)     rows [0:E] -> embed, [E:E+He] -> context
    w_hh_ref,     # (H, 3H)
    b_gi_ref,     # (1, 3H)          b_ih with b_hh folded into the r,z slots
    b_hn_ref,     # (1, H)           b_hh for the n gate
    w_fc_ref,     # (1, 2He + H + E) fc_out weight as a row vector
    b_fc_ref,     # (1, 1)
    out_ref,      # (Bt, S)          per-position logits (lane-dense)
    hid_ref,      # (Bt, H)          new hidden
):
  emb = embed_ref[...]                          # (Bt, E)
  h = h_ref[...]                                # (Bt, H)
  enc = enc_ref[...]                            # (Bt, S, He)
  Bt, S, He = enc.shape
  H = h.shape[1]
  E = emb.shape[1]

  # ---- additive attention (concat-free split of W_attn) --------------------
  # tanh([h ; enc] @ W + b) == tanh(enc @ W_enc + (h @ W_h + b))
  h_part = (jnp.dot(h, w_attn_ref[0:H, :],
                    preferred_element_type=jnp.float32)
            + b_attn_ref[...])                                    # (Bt, H)
  enc2 = enc.reshape(Bt * S, He)                                  # (Bt*S, He)
  e_part = jnp.dot(enc2, w_attn_ref[H:H + He, :],
                   preferred_element_type=jnp.float32)            # (Bt*S, H)
  energy = jnp.tanh(e_part.reshape(Bt, S, H) + h_part[:, None, :])  # (Bt, S, H)

  # lane-major scores + softmax over S (reduce over H goes to XLU)
  scores = jnp.sum(energy * v_ref[...], axis=-1)                  # (Bt, S)
  m = jnp.max(scores, axis=-1, keepdims=True)                     # (Bt, 1)
  p = jnp.exp(scores - m)                                         # (Bt, S)
  inv_l = pl.reciprocal(jnp.sum(p, axis=-1, keepdims=True),
                        approx=True)                              # (Bt, 1)

  # weighted context: softmax(scores) applied to enc, per batch row
  weighted = jnp.sum(p[:, :, None] * enc, axis=1) * inv_l         # (Bt, He)

  # ---- GRU cell (PyTorch gate order r, z, n), concat-free input proj -------
  gi = (jnp.dot(emb, w_ih_ref[0:E, :], preferred_element_type=jnp.float32)
        + jnp.dot(weighted, w_ih_ref[E:E + He, :],
                  preferred_element_type=jnp.float32)
        + b_gi_ref[...])                                          # (Bt, 3H)
  gh = jnp.dot(h, w_hh_ref[...], preferred_element_type=jnp.float32)  # (Bt, 3H)
  r = jax.nn.sigmoid(gi[:, 0:H] + gh[:, 0:H])
  z = jax.nn.sigmoid(gi[:, H:2 * H] + gh[:, H:2 * H])
  n = jnp.tanh(gi[:, 2 * H:3 * H] + r * (gh[:, 2 * H:3 * H] + b_hn_ref[...]))
  h_new = (1.0 - z) * n + z * h                                   # (Bt, H)

  # ---- fc_out: enc-dependent lane reduce + S-invariant per-batch scalar ----
  wf = w_fc_ref[...]                                              # (1, 2He+H+E)
  wf_enc = wf[:, 0:He]
  wf_ctx = wf[:, He:2 * He]
  wf_hid = wf[:, 2 * He:2 * He + H]
  wf_emb = wf[:, 2 * He + H:2 * He + H + E]
  c = (jnp.sum(weighted * wf_ctx, axis=-1, keepdims=True)
       + jnp.sum(h_new * wf_hid, axis=-1, keepdims=True)
       + jnp.sum(emb * wf_emb, axis=-1, keepdims=True)
       + b_fc_ref[...])                                           # (Bt, 1)
  enc_logit = jnp.sum(enc * wf_enc, axis=-1)                      # (Bt, S)

  out_ref[...] = enc_logit + c                                    # (Bt, S)
  hid_ref[...] = h_new                                            # (Bt, H)


# ----------------------------------------------------------------------------
# Wrapper
# ----------------------------------------------------------------------------
def _pick_batch_tile(B):
  """Multiple-of-8 tile dividing B; prefer >= 2 grid steps (feeds 2 TCs on v7x)."""
  for cand in (128, 64, 32, 16, 8):
    if B % cand == 0 and B // cand >= 2:
      return cand
  for cand in (128, 64, 32, 16, 8):
    if B % cand == 0:
      return cand
  return B  # tiny batch: single block equal to the full array


@jax.jit
def decoder_attn_forward(token_ids, prev_hidden, enc_out, params):
  B, S, He = enc_out.shape
  H = prev_hidden.shape[1]
  E = params["embedding"].shape[1]
  Bt = _pick_batch_tile(B)

  # glue: embedding gather (data-dependent) + dropout (identity, eval mode)
  embed = jnp.take(params["embedding"], token_ids, axis=0)        # (B, E)

  # repack weights for the concat-free kernel (traced once, negligible cost)
  v_row = params["v"].reshape(1, H)                               # (1, H)
  b_ih, b_hh = params["b_ih"], params["b_hh"]
  b_gi = jnp.concatenate(
      [b_ih[:, :2 * H] + b_hh[:, :2 * H], b_ih[:, 2 * H:]], axis=1)  # (1, 3H)
  b_hn = b_hh[:, 2 * H:]                                          # (1, H)
  w_fc_row = params["w_fc"].reshape(1, -1)                        # (1, 2He+H+E)

  weights = (params["w_attn"], params["b_attn"], v_row,
             params["w_ih"], params["w_hh"], b_gi, b_hn,
             w_fc_row, params["b_fc"])

  in_specs = [
      pl.BlockSpec((Bt, E), lambda b: (b, 0)),         # embed
      pl.BlockSpec((Bt, H), lambda b: (b, 0)),         # prev hidden
      pl.BlockSpec((Bt, S, He), lambda b: (b, 0, 0)),  # enc_out
  ] + [pl.BlockSpec(w.shape, lambda b: (0, 0)) for w in weights]  # all 2-D

  out_specs = (
      pl.BlockSpec((Bt, S), lambda b: (b, 0)),         # lane-dense logits
      pl.BlockSpec((Bt, H), lambda b: (b, 0)),         # new hidden
  )
  out_shape = (
      jax.ShapeDtypeStruct((B, S), jnp.float32),
      jax.ShapeDtypeStruct((B, H), jnp.float32),
  )

  logits, hidden = pl.pallas_call(
      decoder_attn_kernel,
      grid=(B // Bt,),
      in_specs=in_specs,
      out_specs=out_specs,
      out_shape=out_shape,
      compiler_params=pltpu.CompilerParams(
          dimension_semantics=("parallel",)),
  )(embed, prev_hidden, enc_out, *weights)

  # restore the module's (B, S, 1) interface outside the kernel (free reshape)
  return logits[..., None], hidden


# ----------------------------------------------------------------------------
# Pure-JAX reference (same math, batched) for a sanity check
# ----------------------------------------------------------------------------
def decoder_attn_reference(token_ids, prev_hidden, enc_out, p):
  B, S, He = enc_out.shape
  H = prev_hidden.shape[1]
  embed = jnp.take(p["embedding"], token_ids, axis=0)
  h = prev_hidden
  h_rep = jnp.broadcast_to(h[:, None, :], (B, S, H))
  energy = jnp.tanh(
      jnp.concatenate([h_rep, enc_out], -1) @ p["w_attn"] + p["b_attn"])
  scores = (energy @ p["v"])[..., 0]
  a = jax.nn.softmax(scores, axis=-1)
  weighted = jnp.einsum("bs,bsh->bh", a, enc_out)
  rnn_in = jnp.concatenate([embed, weighted], -1)
  gi = rnn_in @ p["w_ih"] + p["b_ih"]
  gh = h @ p["w_hh"] + p["b_hh"]
  r = jax.nn.sigmoid(gi[:, :H] + gh[:, :H])
  z = jax.nn.sigmoid(gi[:, H:2 * H] + gh[:, H:2 * H])
  n = jnp.tanh(gi[:, 2 * H:] + r * gh[:, 2 * H:])
  h_new = (1.0 - z) * n + z * h
  cat_all = jnp.concatenate([
      enc_out,
      jnp.broadcast_to(weighted[:, None, :], (B, S, He)),
      jnp.broadcast_to(h_new[:, None, :], (B, S, H)),
      jnp.broadcast_to(embed[:, None, :], (B, S, embed.shape[1])),
  ], -1)
  out = cat_all @ p["w_fc"] + p["b_fc"]
  return out, h_new


# ----------------------------------------------------------------------------
# Main
# ----------------------------------------------------------------------------
if __name__ == "__main__":
  B, S = 16, 8                     # B=16, Bt=8 -> 2 parallel grid steps
  VOCAB, EMB = 10, 16
  ENC_HID = DEC_HID = 32           # fc_out in_features assumes enc_hid == dec_hid
  H, He, E = DEC_HID, ENC_HID, EMB

  key = jax.random.PRNGKey(0)
  keys = jax.random.split(key, 12)

  def init(k, shape, scale=0.1):
    return (scale * jax.random.normal(k, shape)).astype(jnp.float32)

  params = {
      "embedding": init(keys[0], (VOCAB, E)),
      # attention: Linear(H+He -> H) (rows [0:H] act on hidden) and v: Linear(H -> 1)
      "w_attn": init(keys[1], (H + He, H)),
      "b_attn": init(keys[2], (1, H)),
      "v": init(keys[3], (H, 1)),
      # GRU: weight_ih / weight_hh pre-transposed to (in, out); rows [0:E] of
      # w_ih act on the embedding, rows [E:E+He] on the attention context.
      "w_ih": init(keys[4], (E + He, 3 * H)),
      "b_ih": init(keys[5], (1, 3 * H)),
      "w_hh": init(keys[6], (H, 3 * H)),
      "b_hh": init(keys[7], (1, 3 * H)),
      # fc_out: Linear(2*dec_hid + emb + enc_hid -> 1)
      "w_fc": init(keys[8], (2 * He + H + E, 1)),
      "b_fc": init(keys[9], (1, 1)),
  }

  token_ids = jax.random.randint(keys[10], (B,), 0, VOCAB, dtype=jnp.int32)
  prev_hidden = init(keys[11], (B, H), scale=0.5)
  enc_out = (0.5 * jax.random.normal(jax.random.PRNGKey(42),
                                     (B, S, He))).astype(jnp.float32)

  out, hidden = decoder_attn_forward(token_ids, prev_hidden, enc_out, params)
  out = jax.block_until_ready(out)
  hidden = jax.block_until_ready(hidden)

  ref_out, ref_hidden = decoder_attn_reference(
      token_ids, prev_hidden, enc_out, params)

  assert out.shape == (B, S, 1) and hidden.shape == (B, H)
  assert jnp.allclose(out, ref_out, atol=2e-3, rtol=2e-3)
  assert jnp.allclose(hidden, ref_hidden, atol=2e-3, rtol=2e-3)

  print("KERNEL_OK")
</pallas_src>

<mosaic_0001>
module attributes {stable_mosaic.version = 11 : i64} {
  func.func @decoder_attn_kernel(%arg0: i32, %arg1: memref<8x16xf32, #tpu.memory_space<vmem>>, %arg2: memref<8x32xf32, #tpu.memory_space<vmem>>, %arg3: memref<8x8x32xf32, #tpu.memory_space<vmem>>, %arg4: memref<64x32xf32, #tpu.memory_space<vmem>>, %arg5: memref<1x32xf32, #tpu.memory_space<vmem>>, %arg6: memref<1x32xf32, #tpu.memory_space<vmem>>, %arg7: memref<48x96xf32, #tpu.memory_space<vmem>>, %arg8: memref<32x96xf32, #tpu.memory_space<vmem>>, %arg9: memref<1x96xf32, #tpu.memory_space<vmem>>, %arg10: memref<1x32xf32, #tpu.memory_space<vmem>>, %arg11: memref<1x112xf32, #tpu.memory_space<vmem>>, %arg12: memref<1x1xf32, #tpu.memory_space<vmem>>, %arg13: memref<8x8xf32, #tpu.memory_space<vmem>>, %arg14: memref<8x32xf32, #tpu.memory_space<vmem>>) attributes {dimension_semantics = [#tpu.dimension_semantics<parallel>], iteration_bounds = array<i64: 2>, scalar_prefetch = 0 : i64, scratch_operands = 0 : i64, tpu.core_type = #tpu.core_type<tc>, window_params = [{transform_indices = @transform_0, window_bounds = array<i64: 8, 16>}, {transform_indices = @transform_1, window_bounds = array<i64: 8, 32>}, {transform_indices = @transform_2, window_bounds = array<i64: 8, 8, 32>}, {pipeline_mode = #tpu.pipeline_mode<synchronous>, transform_indices = @transform_3, window_bounds = array<i64: 64, 32>}, {pipeline_mode = #tpu.pipeline_mode<synchronous>, transform_indices = @transform_4, window_bounds = array<i64: 1, 32>}, {pipeline_mode = #tpu.pipeline_mode<synchronous>, transform_indices = @transform_5, window_bounds = array<i64: 1, 32>}, {pipeline_mode = #tpu.pipeline_mode<synchronous>, transform_indices = @transform_6, window_bounds = array<i64: 48, 96>}, {pipeline_mode = #tpu.pipeline_mode<synchronous>, transform_indices = @transform_7, window_bounds = array<i64: 32, 96>}, {pipeline_mode = #tpu.pipeline_mode<synchronous>, transform_indices = @transform_8, window_bounds = array<i64: 1, 96>}, {pipeline_mode = #tpu.pipeline_mode<synchronous>, transform_indices = @transform_9, window_bounds = array<i64: 1, 32>}, {pipeline_mode = #tpu.pipeline_mode<synchronous>, transform_indices = @transform_10, window_bounds = array<i64: 1, 112>}, {pipeline_mode = #tpu.pipeline_mode<synchronous>, transform_indices = @transform_11, window_bounds = array<i64: 1, 1>}, {transform_indices = @transform_12, window_bounds = array<i64: 8, 8>}, {transform_indices = @transform_13, window_bounds = array<i64: 8, 32>}]} {
    %c0 = arith.constant 0 : index
    %c0_0 = arith.constant 0 : index
    %0 = vector.load %arg1[%c0, %c0_0] : memref<8x16xf32, #tpu.memory_space<vmem>>, vector<8x16xf32>
    %c0_1 = arith.constant 0 : index
    %c0_2 = arith.constant 0 : index
    %1 = vector.load %arg2[%c0_1, %c0_2] : memref<8x32xf32, #tpu.memory_space<vmem>>, vector<8x32xf32>
    %c0_3 = arith.constant 0 : index
    %c0_4 = arith.constant 0 : index
    %c0_5 = arith.constant 0 : index
    %2 = vector.load %arg3[%c0_3, %c0_4, %c0_5] : memref<8x8x32xf32, #tpu.memory_space<vmem>>, vector<8x8x32xf32>
    %c0_6 = arith.constant 0 : index
    %c0_7 = arith.constant 0 : index
    %3 = vector.load %arg4[%c0_6, %c0_7] : memref<64x32xf32, #tpu.memory_space<vmem>>, vector<32x32xf32>
    %cst = arith.constant dense<0.000000e+00> : vector<8x32xf32>
    %4 = tpu.matmul %1, %3, %cst {dimension_numbers = #tpu.dot_dimension_numbers<[1], [0], [0], [1], [0, 0, 1, 1], [], []>} : vector<8x32xf32>, vector<32x32xf32>, vector<8x32xf32> -> vector<8x32xf32>
    %c0_8 = arith.constant 0 : index
    %c0_9 = arith.constant 0 : index
    %5 = vector.load %arg5[%c0_8, %c0_9] : memref<1x32xf32, #tpu.memory_space<vmem>>, vector<1x32xf32>
    %6 = vector.broadcast %5 : vector<1x32xf32> to vector<8x32xf32>
    %7 = arith.addf %4, %6 : vector<8x32xf32>
    %8 = vector.shape_cast %2 : vector<8x8x32xf32> to vector<64x32xf32>
    %c32 = arith.constant 32 : index
    %c0_10 = arith.constant 0 : index
    %9 = vector.load %arg4[%c32, %c0_10] : memref<64x32xf32, #tpu.memory_space<vmem>>, vector<32x32xf32>
    %cst_11 = arith.constant dense<0.000000e+00> : vector<64x32xf32>
    %10 = tpu.matmul %8, %9, %cst_11 {dimension_numbers = #tpu.dot_dimension_numbers<[1], [0], [0], [1], [0, 0, 1, 1], [], []>} : vector<64x32xf32>, vector<32x32xf32>, vector<64x32xf32> -> vector<64x32xf32>
    %11 = vector.shape_cast %10 : vector<64x32xf32> to vector<8x8x32xf32>
    %12 = vector.shape_cast %7 : vector<8x32xf32> to vector<8x1x32xf32>
    %13 = vector.broadcast %12 : vector<8x1x32xf32> to vector<8x8x32xf32>
    %14 = arith.addf %11, %13 : vector<8x8x32xf32>
    %15 = math.tanh %14 : vector<8x8x32xf32>
    %c0_12 = arith.constant 0 : index
    %c0_13 = arith.constant 0 : index
    %16 = vector.load %arg6[%c0_12, %c0_13] : memref<1x32xf32, #tpu.memory_space<vmem>>, vector<1x32xf32>
    %17 = vector.shape_cast %16 : vector<1x32xf32> to vector<1x1x32xf32>
    %18 = vector.broadcast %17 : vector<1x1x32xf32> to vector<8x8x32xf32>
    %19 = arith.mulf %15, %18 : vector<8x8x32xf32>
    %cst_14 = arith.constant dense<0.000000e+00> : vector<8x8xf32>
    %20 = vector.multi_reduction <add>, %19, %cst_14 [2] : vector<8x8x32xf32> to vector<8x8xf32>
    %cst_15 = arith.constant dense<0xFF800000> : vector<8xf32>
    %21 = vector.multi_reduction <maximumf>, %20, %cst_15 [1] : vector<8x8xf32> to vector<8xf32>
    %22 = vector.shape_cast %21 : vector<8xf32> to vector<8x1xf32>
    %23 = vector.broadcast %22 : vector<8x1xf32> to vector<8x8xf32>
    %24 = arith.subf %20, %23 : vector<8x8xf32>
    %25 = math.exp %24 : vector<8x8xf32>
    %cst_16 = arith.constant dense<0.000000e+00> : vector<8xf32>
    %26 = vector.multi_reduction <add>, %25, %cst_16 [1] : vector<8x8xf32> to vector<8xf32>
    %27 = vector.shape_cast %26 : vector<8xf32> to vector<8x1xf32>
    %28 = tpu.reciprocal %27 {approx = true} : vector<8x1xf32> -> vector<8x1xf32>
    %29 = vector.shape_cast %25 : vector<8x8xf32> to vector<8x8x1xf32>
    %30 = vector.broadcast %29 : vector<8x8x1xf32> to vector<8x8x32xf32>
    %31 = arith.mulf %30, %2 : vector<8x8x32xf32>
    %cst_17 = arith.constant dense<0.000000e+00> : vector<8x32xf32>
    %32 = vector.multi_reduction <add>, %31, %cst_17 [1] : vector<8x8x32xf32> to vector<8x32xf32>
    %33 = vector.broadcast %28 : vector<8x1xf32> to vector<8x32xf32>
    %34 = arith.mulf %32, %33 : vector<8x32xf32>
    %c0_18 = arith.constant 0 : index
    %c0_19 = arith.constant 0 : index
    %35 = vector.load %arg7[%c0_18, %c0_19] : memref<48x96xf32, #tpu.memory_space<vmem>>, vector<16x96xf32>
    %cst_20 = arith.constant dense<0.000000e+00> : vector<8x96xf32>
    %36 = tpu.matmul %0, %35, %cst_20 {dimension_numbers = #tpu.dot_dimension_numbers<[1], [0], [0], [1], [0, 0, 1, 1], [], []>} : vector<8x16xf32>, vector<16x96xf32>, vector<8x96xf32> -> vector<8x96xf32>
    %c16 = arith.constant 16 : index
    %c0_21 = arith.constant 0 : index
    %37 = vector.load %arg7[%c16, %c0_21] : memref<48x96xf32, #tpu.memory_space<vmem>>, vector<32x96xf32>
    %cst_22 = arith.constant dense<0.000000e+00> : vector<8x96xf32>
    %38 = tpu.matmul %34, %37, %cst_22 {dimension_numbers = #tpu.dot_dimension_numbers<[1], [0], [0], [1], [0, 0, 1, 1], [], []>} : vector<8x32xf32>, vector<32x96xf32>, vector<8x96xf32> -> vector<8x96xf32>
    %39 = arith.addf %36, %38 : vector<8x96xf32>
    %c0_23 = arith.constant 0 : index
    %c0_24 = arith.constant 0 : index
    %40 = vector.load %arg9[%c0_23, %c0_24] : memref<1x96xf32, #tpu.memory_space<vmem>>, vector<1x96xf32>
    %41 = vector.broadcast %40 : vector<1x96xf32> to vector<8x96xf32>
    %42 = arith.addf %39, %41 : vector<8x96xf32>
    %c0_25 = arith.constant 0 : index
    %c0_26 = arith.constant 0 : index
    %43 = vector.load %arg8[%c0_25, %c0_26] : memref<32x96xf32, #tpu.memory_space<vmem>>, vector<32x96xf32>
    %cst_27 = arith.constant dense<0.000000e+00> : vector<8x96xf32>
    %44 = tpu.matmul %1, %43, %cst_27 {dimension_numbers = #tpu.dot_dimension_numbers<[1], [0], [0], [1], [0, 0, 1, 1], [], []>} : vector<8x32xf32>, vector<32x96xf32>, vector<8x96xf32> -> vector<8x96xf32>
    %45 = vector.extract_strided_slice %42 {offsets = [0, 0], sizes = [8, 32], strides = [1, 1]} : vector<8x96xf32> to vector<8x32xf32>
    %46 = vector.extract_strided_slice %44 {offsets = [0, 0], sizes = [8, 32], strides = [1, 1]} : vector<8x96xf32> to vector<8x32xf32>
    %47 = arith.addf %45, %46 : vector<8x32xf32>
    %48 = arith.negf %47 : vector<8x32xf32>
    %49 = math.exp %48 : vector<8x32xf32>
    %cst_28 = arith.constant 1.000000e+00 : f32
    %50 = vector.broadcast %cst_28 : f32 to vector<8x32xf32>
    %51 = arith.addf %50, %49 : vector<8x32xf32>
    %52 = arith.divf %50, %51 : vector<8x32xf32>
    %53 = vector.extract_strided_slice %42 {offsets = [0, 32], sizes = [8, 32], strides = [1, 1]} : vector<8x96xf32> to vector<8x32xf32>
    %54 = vector.extract_strided_slice %44 {offsets = [0, 32], sizes = [8, 32], strides = [1, 1]} : vector<8x96xf32> to vector<8x32xf32>
    %55 = arith.addf %53, %54 : vector<8x32xf32>
    %56 = arith.negf %55 : vector<8x32xf32>
    %57 = math.exp %56 : vector<8x32xf32>
    %cst_29 = arith.constant 1.000000e+00 : f32
    %58 = vector.broadcast %cst_29 : f32 to vector<8x32xf32>
    %59 = arith.addf %58, %57 : vector<8x32xf32>
    %60 = arith.divf %58, %59 : vector<8x32xf32>
    %61 = vector.extract_strided_slice %42 {offsets = [0, 64], sizes = [8, 32], strides = [1, 1]} : vector<8x96xf32> to vector<8x32xf32>
    %62 = vector.extract_strided_slice %44 {offsets = [0, 64], sizes = [8, 32], strides = [1, 1]} : vector<8x96xf32> to vector<8x32xf32>
    %c0_30 = arith.constant 0 : index
    %c0_31 = arith.constant 0 : index
    %63 = vector.load %arg10[%c0_30, %c0_31] : memref<1x32xf32, #tpu.memory_space<vmem>>, vector<1x32xf32>
    %64 = vector.broadcast %63 : vector<1x32xf32> to vector<8x32xf32>
    %65 = arith.addf %62, %64 : vector<8x32xf32>
    %66 = arith.mulf %52, %65 : vector<8x32xf32>
    %67 = arith.addf %61, %66 : vector<8x32xf32>
    %68 = math.tanh %67 : vector<8x32xf32>
    %cst_32 = arith.constant 1.000000e+00 : f32
    %69 = vector.broadcast %cst_32 : f32 to vector<8x32xf32>
    %70 = arith.subf %69, %60 : vector<8x32xf32>
    %71 = arith.mulf %70, %68 : vector<8x32xf32>
    %72 = arith.mulf %60, %1 : vector<8x32xf32>
    %73 = arith.addf %71, %72 : vector<8x32xf32>
    %c0_33 = arith.constant 0 : index
    %c0_34 = arith.constant 0 : index
    %74 = vector.load %arg11[%c0_33, %c0_34] : memref<1x112xf32, #tpu.memory_space<vmem>>, vector<1x112xf32>
    %75 = vector.extract_strided_slice %74 {offsets = [0, 0], sizes = [1, 32], strides = [1, 1]} : vector<1x112xf32> to vector<1x32xf32>
    %76 = vector.extract_strided_slice %74 {offsets = [0, 32], sizes = [1, 32], strides = [1, 1]} : vector<1x112xf32> to vector<1x32xf32>
    %77 = vector.extract_strided_slice %74 {offsets = [0, 64], sizes = [1, 32], strides = [1, 1]} : vector<1x112xf32> to vector<1x32xf32>
    %78 = vector.extract_strided_slice %74 {offsets = [0, 96], sizes = [1, 16], strides = [1, 1]} : vector<1x112xf32> to vector<1x16xf32>
    %79 = vector.broadcast %76 : vector<1x32xf32> to vector<8x32xf32>
    %80 = arith.mulf %34, %79 : vector<8x32xf32>
    %cst_35 = arith.constant dense<0.000000e+00> : vector<8xf32>
    %81 = vector.multi_reduction <add>, %80, %cst_35 [1] : vector<8x32xf32> to vector<8xf32>
    %82 = vector.shape_cast %81 : vector<8xf32> to vector<8x1xf32>
    %83 = vector.broadcast %77 : vector<1x32xf32> to vector<8x32xf32>
    %84 = arith.mulf %73, %83 : vector<8x32xf32>
    %cst_36 = arith.constant dense<0.000000e+00> : vector<8xf32>
    %85 = vector.multi_reduction <add>, %84, %cst_36 [1] : vector<8x32xf32> to vector<8xf32>
    %86 = vector.shape_cast %85 : vector<8xf32> to vector<8x1xf32>
    %87 = arith.addf %82, %86 : vector<8x1xf32>
    %88 = vector.broadcast %78 : vector<1x16xf32> to vector<8x16xf32>
    %89 = arith.mulf %0, %88 : vector<8x16xf32>
    %cst_37 = arith.constant dense<0.000000e+00> : vector<8xf32>
    %90 = vector.multi_reduction <add>, %89, %cst_37 [1] : vector<8x16xf32> to vector<8xf32>
    %91 = vector.shape_cast %90 : vector<8xf32> to vector<8x1xf32>
    %92 = arith.addf %87, %91 : vector<8x1xf32>
    %c0_38 = arith.constant 0 : index
    %c0_39 = arith.constant 0 : index
    %93 = vector.load %arg12[%c0_38, %c0_39] : memref<1x1xf32, #tpu.memory_space<vmem>>, vector<1x1xf32>
    %94 = vector.broadcast %93 : vector<1x1xf32> to vector<8x1xf32>
    %95 = arith.addf %92, %94 : vector<8x1xf32>
    %96 = vector.shape_cast %75 : vector<1x32xf32> to vector<1x1x32xf32>
    %97 = vector.broadcast %96 : vector<1x1x32xf32> to vector<8x8x32xf32>
    %98 = arith.mulf %2, %97 : vector<8x8x32xf32>
    %cst_40 = arith.constant dense<0.000000e+00> : vector<8x8xf32>
    %99 = vector.multi_reduction <add>, %98, %cst_40 [2] : vector<8x8x32xf32> to vector<8x8xf32>
    %100 = vector.broadcast %95 : vector<8x1xf32> to vector<8x8xf32>
    %101 = arith.addf %99, %100 : vector<8x8xf32>
    %c0_41 = arith.constant 0 : index
    %c0_42 = arith.constant 0 : index
    %102 = vector.load %arg13[%c0_41, %c0_42] : memref<8x8xf32, #tpu.memory_space<vmem>>, vector<8x8xf32>
    tpu.vector_store %arg13[%c0_41, %c0_42], %101 {strides = array<i32>} : memref<8x8xf32, #tpu.memory_space<vmem>>, vector<8x8xf32>,
    %c0_43 = arith.constant 0 : index
    %c0_44 = arith.constant 0 : index
    %103 = vector.load %arg14[%c0_43, %c0_44] : memref<8x32xf32, #tpu.memory_space<vmem>>, vector<8x32xf32>
    tpu.vector_store %arg14[%c0_43, %c0_44], %73 {strides = array<i32>} : memref<8x32xf32, #tpu.memory_space<vmem>>, vector<8x32xf32>,
    return
  }
  func.func @transform_0(%arg0: i32) -> (i32, i32) {
    %c0_i32 = arith.constant 0 : i32
    %c0_i32_0 = arith.constant 0 : i32
    return %arg0, %c0_i32 : i32, i32
  }
  func.func @transform_1(%arg0: i32) -> (i32, i32) {
    %c0_i32 = arith.constant 0 : i32
    %c0_i32_0 = arith.constant 0 : i32
    return %arg0, %c0_i32 : i32, i32
  }
  func.func @transform_2(%arg0: i32) -> (i32, i32, i32) {
    %c0_i32 = arith.constant 0 : i32
    %c0_i32_0 = arith.constant 0 : i32
    %c0_i32_1 = arith.constant 0 : i32
    return %arg0, %c0_i32, %c0_i32_0 : i32, i32, i32
  }
  func.func @transform_3(%arg0: i32) -> (i32, i32) {
    %c0_i32 = arith.constant 0 : i32
    %c0_i32_0 = arith.constant 0 : i32
    %c0_i32_1 = arith.constant 0 : i32
    return %c0_i32, %c0_i32_0 : i32, i32
  }
  func.func @transform_4(%arg0: i32) -> (i32, i32) {
    %c0_i32 = arith.constant 0 : i32
    %c0_i32_0 = arith.constant 0 : i32
    %c0_i32_1 = arith.constant 0 : i32
    return %c0_i32, %c0_i32_0 : i32, i32
  }
  func.func @transform_5(%arg0: i32) -> (i32, i32) {
    %c0_i32 = arith.constant 0 : i32
    %c0_i32_0 = arith.constant 0 : i32
    %c0_i32_1 = arith.constant 0 : i32
    return %c0_i32, %c0_i32_0 : i32, i32
  }
  func.func @transform_6(%arg0: i32) -> (i32, i32) {
    %c0_i32 = arith.constant 0 : i32
    %c0_i32_0 = arith.constant 0 : i32
    %c0_i32_1 = arith.constant 0 : i32
    return %c0_i32, %c0_i32_0 : i32, i32
  }
  func.func @transform_7(%arg0: i32) -> (i32, i32) {
    %c0_i32 = arith.constant 0 : i32
    %c0_i32_0 = arith.constant 0 : i32
    %c0_i32_1 = arith.constant 0 : i32
    return %c0_i32, %c0_i32_0 : i32, i32
  }
  func.func @transform_8(%arg0: i32) -> (i32, i32) {
    %c0_i32 = arith.constant 0 : i32
    %c0_i32_0 = arith.constant 0 : i32
    %c0_i32_1 = arith.constant 0 : i32
    return %c0_i32, %c0_i32_0 : i32, i32
  }
  func.func @transform_9(%arg0: i32) -> (i32, i32) {
    %c0_i32 = arith.constant 0 : i32
    %c0_i32_0 = arith.constant 0 : i32
    %c0_i32_1 = arith.constant 0 : i32
    return %c0_i32, %c0_i32_0 : i32, i32
  }
  func.func @transform_10(%arg0: i32) -> (i32, i32) {
    %c0_i32 = arith.constant 0 : i32
    %c0_i32_0 = arith.constant 0 : i32
    %c0_i32_1 = arith.constant 0 : i32
    return %c0_i32, %c0_i32_0 : i32, i32
  }
  func.func @transform_11(%arg0: i32) -> (i32, i32) {
    %c0_i32 = arith.constant 0 : i32
    %c0_i32_0 = arith.constant 0 : i32
    %c0_i32_1 = arith.constant 0 : i32
    return %c0_i32, %c0_i32_0 : i32, i32
  }
  func.func @transform_12(%arg0: i32) -> (i32, i32) {
    %c0_i32 = arith.constant 0 : i32
    %c0_i32_0 = arith.constant 0 : i32
    return %arg0, %c0_i32 : i32, i32
  }
  func.func @transform_13(%arg0: i32) -> (i32, i32) {
    %c0_i32 = arith.constant 0 : i32
    %c0_i32_0 = arith.constant 0 : i32
    return %arg0, %c0_i32 : i32, i32
  }
}

</mosaic_0001>

<bundles_post_ra>
// kernel: decoder_attn_forward.1
= control target key start
LH: loop header
LB: loop body
LE: loop exit
PB: predicated region body
PF: predicated region fallthrough
CT: control target
= control target key end

     0   :  { %s2644_s0 = inlined_call_operand.vmem [shape: f32[16,16], index: 0, kind: input, shape index: {}]   ;;  %s2645_s1 = inlined_call_operand.vmem [shape: f32[16,32], index: 1, kind: input, shape index: {}]   ;;  %s2646_s2 = inlined_call_operand.vmem [shape: f32[16,8,32], index: 2, kind: input, shape index: {}]   ;;  %s2647_s3 = inlined_call_operand.vmem [shape: f32[64,32], index: 3, kind: input, shape index: {}]   ;;  %s2648_s4 = inlined_call_operand.vmem [shape: f32[1,32], index: 4, kind: input, shape index: {}]   ;;  %s2649_s5 = inlined_call_operand.vmem [shape: f32[1,32], index: 5, kind: input, shape index: {}]   ;;  %s2650_s6 = inlined_call_operand.vmem [shape: f32[48,96], index: 6, kind: input, shape index: {}]   ;;  %s2651_s7 = inlined_call_operand.vmem [shape: f32[32,96], index: 7, kind: input, shape index: {}]   ;;  %s2652_s8 = inlined_call_operand.vmem [shape: f32[1,96], index: 8, kind: input, shape index: {}]   ;;  %s2653_s9 = inlined_call_operand.vmem [shape: f32[1,32], index: 9, kind: input, shape index: {}]   ;;  %s2654_s10 = inlined_call_operand.vmem [shape: f32[1,112], index: 10, kind: input, shape index: {}]   ;;  %s2655_s11 = inlined_call_operand.<no memory space> [shape: f32[1,1], index: 11, kind: input, shape index: {}]   ;;  %s2656_s12 = inlined_call_operand.vmem [shape: f32[16,8], index: 12, kind: output, shape index: {0}]   ;;  %s2657_s13 = inlined_call_operand.hbm [shape: f32[16,32], index: 13, kind: output, shape index: {1}]  }
   0x1   :  { %v19_v0 = vstv %s2655_s11 }
   0x2   :  { %20 = vst [vmem:[#allocation2] sm:$0x1] %v19_v0 }
   0x3   :  { %21 = vsyncpa [#allocation4], 0 }
   0x4   :  { %23 = vsyncpa [#allocation4 + $0x1], 0  ;;  %s2167_s27 = smov 0   ;;  %s2169_s28 = smov 0  }
   0x5   :  { %s2171_s29 = smov 0   ;;  %s2173_s30 = smov 0  }
   0x6 LB: > { %2660 = sst [smem:[#allocation6_spill]] %s2080_s29  ;;  %s2188_s11 = sadd.s32 4294967295, %s2084_s30   ;;  %s2084_s30 = sphi %s2173_s30, %s2669_s30   ;;  %s2080_s29 = sphi %s2171_s29, %s2666_s29   ;;  %s2076_s28 = sphi %s2169_s28, %s2668_s28   ;;  %s2072_s27 = sphi %s2167_s27, %s2667_s27  }
   0x7   : > { %s1813_s14 = sadd.s32 4294967294, %s2084_s30   ;;  %s2192_s15 = sadd.s32 1, %s2084_s30  }
   0x8   : > { %s329_s16 = sadd.s32 1, %s2080_s29  ;;  %s326_s17 = ssub.s32 %s2084_s30, %s2192_s15 }
   0x9   : > { %p339_p0 = scmp.ne.s32.totalorder %s2080_s29, %s2076_s28  ;;  %p327_p1 = scmp.eq.s32.totalorder %s326_s17, 0 }
   0xa   : > { %p340_p2 = scmp.eq.s32.totalorder %s2188_s11, 1  ;;  %p345_p3 = scmp.ne.s32.totalorder %s2076_s28, %s2072_s27 }
   0xb   : > { %p346_p4 = scmp.eq.s32.totalorder %s1813_s14, 1  ;;  %p1816_p7 = scmp.ge.s32.totalorder %s2084_s30, 1 }
   0xc   : > { %s2203_s18 = scalar_select %p327_p1, %s2080_s29, %s329_s16  }
   0xd   : > { %p2205_p5 = por %p340_p2, %p339_p0  ;;  %p2209_p6 = por %p346_p4, %p345_p3 }
   0xe   : > { %2661 = sst [smem:[#allocation7_spill]] %s2203_s18  ;;  %p414_p8 = scmp.lt.s32.totalorder %s2084_s30, 3 }
  0x10   : > { %p415_p9 = pnand %p1816_p7, %p414_p8 }
  0x11   : > { %s1820_s14 = sshll.u32 (!%p415_p9), %s2188_s11, 3  ;;  %p470_p11 = scmp.lt.s32.totalorder (!%p415_p9), %s2188_s11, 1 }
  0x12   : > { %418 = sbr.rel (%p415_p9) target bundleno = 1920 (0x780), region = 68  ;;  %p479_p10 = scmp.lt.s32.totalorder (!%p415_p9), %s1820_s14, 15 }
  0x13   : > { %s2091_s21 = smov (!%p415_p9), 32   ;;  %s1843_s26 = sshll.u32 (!%p415_p9), %s2188_s11, 7 }
  0x17   : > { %v586_v1 = vld [vmem:[%s2647_s3 + $0x38] sm:$0xff]  ;;  %v585_v3 = vld [vmem:[%s2647_s3 + $0x30] sm:$0xff]  ;;  %v2086_v4 = vmov 0.0   ;;  %v584_v6 = vld [vmem:[%s2647_s3 + $0x28] sm:$0xff]  ;;  %s2671_s14 = smov (!%p479_p10, %s1820_s14), 15  ;;  %vm509_vm0 = vcmask 261120   ;;  %v721_v21 = vlaneseq }
  0x18   : > { %v501_v2 = vld [vmem:[%s2647_s3 + $0x18] sm:$0xff]  ;;  %1876 = vmatprep.subr.mxu0 %v2086_v4  ;;  %1887 = vmatprep.subr.mxu1 %v586_v1  ;;  %v500_v5 = vld [vmem:[%s2647_s3 + $0x10] sm:$0xff]  ;;  %v499_v7 = vld [vmem:[%s2647_s3 + $0x8] sm:$0xff]  ;;  %s471_s16 = scalar_select %p470_p11, %s2188_s11, 1  ;;  %vm2087_vm1 = vmmov 0   ;;  %vm903_vm2 = vcmask 1041409  }
  0x19   : > { %1877 = vmatpush3.msra.mxu0 %v501_v2  ;;  %1888 = vmatpush3.msra.mxu1 %v586_v1  ;;  %v583_v8 = vld [vmem:[%s2647_s3 + $0x20] sm:$0xff]  ;;  %s1821_s22 = sshll.u32 %s2671_s14, 3  ;;  %v2088_v19 = vmov 1966171168   ;;  %v2300_v23 = vshrl.u32 %v721_v21, 7  ;;  %vm905_vm3 = vcmask 1042434  }
  0x1a   : > { %1878 = vmatprep.subr.mxu0 %v2086_v4  ;;  %1889 = vmatprep.subr.mxu1 %v585_v3  ;;  %v498_v9 = vld [vmem:[%s2647_s3] sm:$0xff]  ;;  %s482_s18 = scalar_lea.vmem %s2646_s2, %s1821_s22  ;;  %s2248_s29 = sshll.u32 %s471_s16, 3  ;;  %v719_v20 = vunpack.c.l.s4 %v2088_v19  ;;  %vm907_vm4 = vcmask 1043459   ;;  %vm909_vm5 = vcmask 1044484   ;;  %vm911_vm6 = vcmask 1045509  }
  0x1b   : > { %1879 = vmatpush3.msra.mxu0 %v500_v5  ;;  %1890 = vmatpush3.msra.mxu1 %v585_v3  ;;  %v2251_v10 = vld [vmem:[%s482_s18] sm:$0xff]  ;;  %s477_s17 = scalar_lea.vmem %s2645_s1, %s2248_s29  ;;  %v2257_v11 = vld [vmem:[%s482_s18 + $0x8] sm:$0xff]  ;;  %v2263_v13 = vld [vmem:[%s482_s18 + $0x10] sm:$0xff]  ;;  %v2307_v33 = vsub.s32 0, %v2300_v23  ;;  %vm913_vm7 = vcmask 1046534   ;;  %vm915_vm8 = vcmask 1047559   ;;  %s473_s25 = scalar_lea.vmem %s2644_s0, %s2248_s29 }
  0x1c   : > { %1880 = vmatprep.subr.mxu0 %v2086_v4  ;;  %1891 = vmatprep.subr.mxu1 %v584_v6  ;;  %v2261_v12 = vld [vmem:[%s477_s17] sm:$0xff]  ;;  %v2273_v14 = vld [vmem:[%s482_s18 + $0x18] sm:$0xff]  ;;  %v2285_v16 = vld [vmem:[%s482_s18 + $0x28] sm:$0xff]  ;;  %v720_v22 = vunpack.c.0.s8 %v719_v20  ;;  %vm918_vm9 = vcmask 64512   ;;  %vm1259_vm10 = vcmask 130048   ;;  %s2092_s22 = smov 96  }
  0x1d   : > { %1881 = vmatpush3.msra.mxu0 %v499_v7  ;;  %1892 = vmatpush3.msra.mxu1 %v584_v6  ;;  %v2276_v15 = vld [vmem:[%s482_s18 + $0x20] sm:$0xff]  ;;  %v2287_v17 = vld [vmem:[%s482_s18 + $0x30] sm:$0xff]  ;;  %v2293_v18 = vld [vmem:[%s482_s18 + $0x38] sm:$0xff]  ;;  %s2090_s18 = smov 64  }
  0x1e   : > { %1882 = vmatprep.subr.mxu0 %v2086_v4  ;;  %1893 = vmatprep.subr.mxu1 %v583_v8  ;;  %v1823_v24 = vld [vmem:[%s2648_s4] ss:$0 sm:$0xff]  ;;  %v723_v25 = vsub.s32 %v720_v22, %v2300_v23 }
  0x1f   : > { %1883 = vmatpush3.msra.mxu0 %v498_v9  ;;  %1884 = vmatprep.mubr.msk.f32.mxu0 %vm2087_vm1, %v2086_v4  ;;  %v1833_v3 = vld [vmem:[%s2649_s5] ss:$0 sm:$0xff] }
  0x20   : > { %1894 = vmatpush3.msra.mxu1 %v583_v8  ;;  %1895 = vmatprep.mubr.msk.f32.mxu1 %vm509_vm0, %v2251_v10 }
  0x21   : > { %1885 = vmatmul.mubr.msk.f32.vlgmr.msra.gmra.mxu0 %vm509_vm0, %v2261_v12  ;;  %1896 = vmatmul.mubr.msk.f32.vlgmr.msra.gmra.mxu1 %vm509_vm0, %v2257_v11 }
  0x22   : > { %1898 = vmatprep.mubr.msk.f32.mxu1 %vm509_vm0, %v2263_v13  ;;  %1925 = vmatprep.subr.mxu1 %v2086_v4 }
  0x23   : > { %1907 = vmatprep.subr.mxu0 %v2086_v4  ;;  %1915 = vmatprep.mubr.msk.f32.mxu0 %vm2087_vm1, %v2086_v4 }
  0x25   : > { %1899 = vmatmul.mubr.msk.f32.gmra.mxu1 %vm509_vm0, %v2273_v14 }
  0x26   : > { %1901 = vmatprep.mubr.msk.f32.mxu1 %vm509_vm0, %v2276_v15 }
  0x29   : > { %1902 = vmatmul.mubr.msk.f32.gmra.mxu1 %vm509_vm0, %v2285_v16 }
  0x2a   : > { %1904 = vmatprep.mubr.msk.f32.mxu1 %vm509_vm0, %v2287_v17 }
  0x2d   : > { %1905 = vmatmul.mubr.msk.f32.gmra.mxu1 %vm509_vm0, %v2293_v18 }
  0x2e   : > { %1933 = vmatprep.mubr.msk.f32.mxu1 %vm2087_vm1, %v2086_v4 }
  0xe1   : > { %v579_v26 = vpop.f32.mrf.mxu0  ;;  %v1897_v27 = vpop.f32.mrf.mxu1 }
  0xe2   : > { %v580_v28 = vadd.f32 %v1823_v24, %v579_v26 }
  0xe3   : > { %v1886_v29 = vpop.f32.mrf.mxu0  ;;  %v677_v30 = vpop.f32.mrf.mxu1 }
  0xe4   : > { %v717_v31 = vcombine.high %v580_v28, %v580_v28  ;;  %v724_v32 = vrot.slane %v580_v28, %v723_v25 }
  0xe5   : > { %v1900_v34 = vpop.f32.mrf.mxu1 }
  0xe6   : > { %v731_v35 = vrot.slane %v717_v31, %v723_v25  ;;  %v732_v36 = vcombine.high %v724_v32, %v724_v32  ;;  %v740_v37 = vrot.slane %v724_v32, %v723_v25 }
  0xe7   : > { %v687_v38 = vpop.f32.mrf.mxu1 }
  0xe8   : > { %v754_v39 = vrot.slane %v732_v36, %v723_v25  ;;  %v769_v40 = vrot.slane %v740_v37, %v2307_v33  ;;  %v762_v41 = vcombine.high %v740_v37, %v740_v37  ;;  %v733_v42 = vcombine.high %v731_v35, %v731_v35 }
  0xe9   : > { %v1903_v43 = vpop.f32.mrf.mxu1  ;;  %v747_v44 = vrot.slane %v731_v35, %v723_v25 }
  0xea   : > { %v773_v45 = vrot.slane %v754_v39, %v2307_v33  ;;  %v806_v46 = vadd.f32 %v769_v40, %v677_v30  ;;  %v764_v47 = vcombine.high %v754_v39, %v754_v39  ;;  %v777_v48 = vrot.slane %v762_v41, %v2307_v33 }
  0xeb   : > { %v761_v49 = vrot.slane %v733_v42, %v723_v25  ;;  %v697_v50 = vpop.f32.mrf.mxu1  ;;  %v785_v51 = vrot.slane %v747_v44, %v2307_v33  ;;  %v763_v52 = vcombine.high %v747_v44, %v747_v44  ;;  %v870_v41 = vand.u32 127, %v721_v21 }
  0xec   : > { %v807_v53 = vadd.f32 %v1897_v27, %v773_v45  ;;  %1984 = vtanh.f32 %v806_v46  ;;  %v781_v54 = vrot.slane %v764_v47, %v2307_v33  ;;  %v808_v55 = vadd.f32 %v777_v48, %v687_v38 }
  0xed   : > { %v789_v56 = vrot.slane %v761_v49, %v2307_v33  ;;  %v1906_v57 = vpop.f32.mrf.mxu1  ;;  %v765_v58 = vcombine.high %v761_v49, %v761_v49  ;;  %v810_v60 = vadd.f32 %v785_v51, %v697_v50  ;;  %v793_v61 = vrot.slane %v763_v52, %v2307_v33 }
  0xee   : > { %1986 = vtanh.f32 %v807_v53  ;;  %v809_v59 = vadd.f32 %v1900_v34, %v781_v54 }
  0xef   : > { %1988 = vtanh.f32 %v808_v55  ;;  %v811_v62 = vadd.f32 %v1903_v43, %v789_v56  ;;  %v797_v63 = vrot.slane %v765_v58, %v2307_v33  ;;  %v707_v0 = vpop.f32.mrf.mxu1  ;;  %v2330_v43 = vsub.s32 %v870_v41, %v2300_v23 }
  0xf0   : > { %1990 = vtanh.f32 %v809_v59  ;;  %v812_v1 = vadd.f32 %v793_v61, %v707_v0 }
  0xf1   : > { %1992 = vtanh.f32 %v810_v60  ;;  %v813_v2 = vadd.f32 %v1906_v57, %v797_v63 }
  0xf2   : > { %1994 = vtanh.f32 %v811_v62 }
  0xf3   : > { %1996 = vtanh.f32 %v812_v1 }
  0xf4   : > { %1998 = vtanh.f32 %v813_v2  ;;  %v2089_v2 = vmov 0  }
  0xf5   : > { %1983 = vset.pattern.permute.xlu0 %v2089_v2  ;;  %1982 = vset.pattern.permute.xlu1 %v2089_v2 }
  0xf9   : > { %v1985_v5 = vpop.eup %1984 }
  0xfa   : > { %v829_v6 = vmul.f32 %v1985_v5, %v1833_v3  ;;  %v933_v5 = vsub.s32 2, %v2300_v23 }
  0xfb   : > { %v1987_v7 = vpop.eup %1986 }
  0xfc   : > { %v1989_v8 = vpop.eup %1988  ;;  %v837_v9 = vsel %vm509_vm0, %v829_v6, 0.0  ;;  %v830_v19 = vmul.f32 %v1987_v7, %v1833_v3  ;;  %v937_v6 = vsub.s32 3, %v2300_v23 }
  0xfd   : > { %v1991_v20 = vpop.eup %1990  ;;  %838 = vadd.xlane.f32.xlu0 %v837_v9  ;;  %v831_v22 = vmul.f32 %v1989_v8, %v1833_v3 }
  0xfe   : > { %v1993_v24 = vpop.eup %1992  ;;  %v832_v26 = vmul.f32 %v1991_v20, %v1833_v3  ;;  %v840_v28 = vsel %vm509_vm0, %v830_v19, 0.0  ;;  %v941_v20 = vsub.s32 4, %v2300_v23 }
  0xff   : > { %v843_v25 = vsel %vm509_vm0, %v831_v22, 0.0  ;;  %v1995_v27 = vpop.eup %1994  ;;  %v833_v29 = vmul.f32 %v1993_v24, %v1833_v3 }
 0x100   : > { %844 = vadd.xlane.f32.xlu1 %v843_v25  ;;  %v1997_v30 = vpop.eup %1996  ;;  %v846_v31 = vsel %vm509_vm0, %v832_v26, 0.0  ;;  %v834_v32 = vmul.f32 %v1995_v27, %v1833_v3 }
 0x101   : > { %841 = vadd.xlane.f32.xlu0 %v840_v28  ;;  %v1999_v34 = vpop.eup %1998  ;;  %v849_v35 = vsel %vm509_vm0, %v833_v29, 0.0  ;;  %v835_v36 = vmul.f32 %v1997_v30, %v1833_v3  ;;  %v945_v29 = vsub.s32 5, %v2300_v23 }
 0x102   : > { %v852_v37 = vsel %vm509_vm0, %v834_v32, 0.0  ;;  %v836_v38 = vmul.f32 %v1999_v34, %v1833_v3  ;;  %v929_v3 = vsub.s32 1, %v2300_v23  ;;  %v949_v34 = vsub.s32 6, %v2300_v23 }
 0x103   : > { %v855_v39 = vsel %vm509_vm0, %v835_v36, 0.0 }
 0x104   : > { %847 = vadd.xlane.f32.xlu1 %v846_v31  ;;  %v858_v40 = vsel %vm509_vm0, %v836_v38, 0.0  ;;  %v953_v38 = vsub.s32 7, %v2300_v23 }
 0x105   : > { %850 = vadd.xlane.f32.xlu0 %v849_v35 }
 0x108   : > { %853 = vadd.xlane.f32.xlu1 %v852_v37 }
 0x109   : > { %856 = vadd.xlane.f32.xlu0 %v855_v39 }
 0x10c   : > { %859 = vadd.xlane.f32.xlu1 %v858_v40 }
 0x186   : > { %v839_v42 = vpop.xlane.xlu0 %838 }
 0x187   : > { %v874_v46 = vrot.slane %v839_v42, %v2330_v43 }
 0x189   : > { %v845_v44 = vpop.xlane.xlu1 %844 }
 0x18a   : > { %v842_v45 = vpop.xlane.xlu0 %841  ;;  %v882_v48 = vrot.slane %v845_v44, %v2330_v43 }
 0x18b   : > { %v878_v47 = vrot.slane %v842_v45, %v2330_v43 }
 0x18d   : > { %v904_v49 = vsel %vm903_vm2, %v878_v47, %v874_v46  ;;  %v848_v50 = vpop.xlane.xlu1 %847 }
 0x18e   : > { %v906_v21 = vsel %vm905_vm3, %v882_v48, %v904_v49  ;;  %v886_v51 = vrot.slane %v848_v50, %v2330_v43  ;;  %v851_v52 = vpop.xlane.xlu0 %850 }
 0x18f   : > { %v890_v53 = vrot.slane %v851_v52, %v2330_v43 }
 0x190   : > { %v908_v54 = vsel %vm907_vm4, %v886_v51, %v906_v21 }
 0x191   : > { %v910_v55 = vsel %vm909_vm5, %v890_v53, %v908_v54  ;;  %v854_v56 = vpop.xlane.xlu1 %853 }
 0x192   : > { %v894_v57 = vrot.slane %v854_v56, %v2330_v43  ;;  %v857_v58 = vpop.xlane.xlu0 %856 }
 0x193   : > { %v898_v59 = vrot.slane %v857_v58, %v2330_v43 }
 0x194   : > { %v912_v60 = vsel %vm911_vm6, %v894_v57, %v910_v55  ;;  %v1343_v57 = vld [vmem:[%s2651_s7 + $0x10] sm:$0xff] }
 0x195   : > { %v860_v61 = vpop.xlane.xlu1 %859  ;;  %v914_v62 = vsel %vm913_vm7, %v898_v59, %v912_v60  ;;  %v1341_v59 = vld [vmem:[%s2651_s7] sm:$0xff] }
 0x196   : > { %v902_v63 = vrot.slane %v860_v61, %v2330_v43 }
 0x198   : > { %v916_v0 = vsel %vm915_vm8, %v902_v63, %v914_v62 }
 0x199   : > { %v919_v1 = vsel %vm918_vm9, %v916_v0, -inf }
 0x19a   : > { %920 = vmax.xlane.f32.xlu0 %v919_v1 }
 0x223   : > { %v921_v7 = vpop.xlane.xlu0 %920 }
 0x224   : > { %v926_v8 = vrot.slane %v921_v7, %v2307_v33  ;;  %v930_v9 = vrot.slane %v921_v7, %v929_v3  ;;  %v934_v19 = vrot.slane %v921_v7, %v933_v5  ;;  %v938_v22 = vrot.slane %v921_v7, %v937_v6 }
 0x225   : > { %v942_v30 = vrot.slane %v921_v7, %v941_v20  ;;  %v946_v35 = vrot.slane %v921_v7, %v945_v29  ;;  %v950_v39 = vrot.slane %v921_v7, %v949_v34 }
 0x226   : > { %v963_v24 = vsub.f32 %v839_v42, %v926_v8  ;;  %v964_v25 = vsub.f32 %v842_v45, %v930_v9  ;;  %v965_v26 = vsub.f32 %v845_v44, %v934_v19  ;;  %v966_v31 = vsub.f32 %v848_v50, %v938_v22 }
 0x227   : > { %v967_v36 = vsub.f32 %v851_v52, %v942_v30  ;;  %v968_v40 = vsub.f32 %v854_v56, %v946_v35  ;;  %v954_v42 = vrot.slane %v921_v7, %v953_v38  ;;  %v969_v44 = vsub.f32 %v857_v58, %v950_v39  ;;  %v1344_v56 = vld [vmem:[%s2651_s7 + $0x18] sm:$0xff]  ;;  %v1342_v58 = vld [vmem:[%s2651_s7 + $0x8] sm:$0xff] }
 0x228   : > { %v971_v27 = vmul.f32 1.442695, %v963_v24  ;;  %v973_v28 = vmul.f32 1.442695, %v964_v25  ;;  %v975_v32 = vmul.f32 1.442695, %v965_v26  ;;  %1926 = vmatpush3.msra.mxu1 %v1344_v56 }
 0x229   : > { %v977_v37 = vmul.f32 1.442695, %v966_v31  ;;  %v979_v41 = vmul.f32 1.442695, %v967_v36  ;;  %v981_v45 = vmul.f32 1.442695, %v968_v40  ;;  %v970_v48 = vsub.f32 %v860_v61, %v954_v42  ;;  %1927 = vmatprep.subr.mxu1 %v2086_v4 }
 0x22a   : > { %2000 = vpow2.f32 %v971_v27  ;;  %v983_v49 = vmul.f32 1.442695, %v969_v44  ;;  %1928 = vmatpush3.msra.mxu1 %v1343_v57  ;;  %v1164_v40 = vld [vmem:[%s2650_s6 + $0x28] sm:$0xff]  ;;  %v1162_v42 = vld [vmem:[%s2650_s6 + $0x18] sm:$0xff]  ;;  %v1161_v44 = vld [vmem:[%s2650_s6 + $0x10] sm:$0xff] }
 0x22b   : > { %2002 = vpow2.f32 %v973_v28  ;;  %v985_v21 = vmul.f32 1.442695, %v970_v48  ;;  %1929 = vmatprep.subr.mxu1 %v2086_v4  ;;  %1908 = vmatpush3.msra.mxu0 %v1164_v40 }
 0x22c   : > { %2004 = vpow2.f32 %v975_v32  ;;  %1930 = vmatpush3.msra.mxu1 %v1342_v58  ;;  %1909 = vmatprep.subr.mxu0 %v2086_v4 }
 0x22d   : > { %2006 = vpow2.f32 %v977_v37  ;;  %1931 = vmatprep.subr.mxu1 %v2086_v4 }
 0x22e   : > { %2008 = vpow2.f32 %v979_v41  ;;  %1932 = vmatpush3.msra.mxu1 %v1341_v59  ;;  %v1163_v41 = vld [vmem:[%s2650_s6 + $0x20] sm:$0xff] }
 0x22f   : > { %2010 = vpow2.f32 %v981_v45  ;;  %1934 = vmatmul.mubr.msk.f32.vlgmr.msra.gmra.mxu1 %vm509_vm0, %v2261_v12  ;;  %1910 = vmatpush3.msra.mxu0 %v1163_v41  ;;  %v1839_v45 = vld [vmem:[%s2653_s9] ss:$0 sm:$0xff] }
 0x230   : > { %2012 = vpow2.f32 %v983_v49  ;;  %1911 = vmatprep.subr.mxu0 %v2086_v4 }
 0x231   : > { %2014 = vpow2.f32 %v985_v21  ;;  %1912 = vmatpush3.msra.mxu0 %v1162_v42 }
 0x232   : > { %1913 = vmatprep.subr.mxu0 %v2086_v4 }
 0x233   : > { %1914 = vmatpush3.msra.mxu0 %v1161_v44 }
 0x234   : > { %1918 = vmatprep.subr.mxu0 %v2086_v4 }
 0x237   : > { %v2001_v46 = vpop.eup %2000 }
 0x238   : > { %v2003_v47 = vpop.eup %2002  ;;  %996 = vperm.xlu1 %1982, %v2001_v46  }
 0x239   : > { %999 = vperm.xlu0 %1983, %v2003_v47   ;;  %v2005_v50 = vpop.eup %2004 }
 0x23a   : > { %v2007_v51 = vpop.eup %2006 }
 0x23b   : > { %v2009_v52 = vpop.eup %2008 }
 0x23c   : > { %1002 = vperm.xlu1 %1982, %v2005_v50   ;;  %v2011_v53 = vpop.eup %2010 }
 0x23d   : > { %v2013_v54 = vpop.eup %2012  ;;  %1428 = vrot.lane.b32.xlu0 %v1839_v45, %s2090_s18 }
 0x23e   : > { %v2015_v55 = vpop.eup %2014 }
 0x240   : > { %1005 = vperm.xlu1 %1982, %v2007_v51  }
 0x244   : > { %1008 = vperm.xlu1 %1982, %v2009_v52  }
 0x248   : > { %1011 = vperm.xlu1 %1982, %v2011_v53  }
 0x24c   : > { %1014 = vperm.xlu1 %1982, %v2013_v54  }
 0x250   : > { %1017 = vperm.xlu1 %1982, %v2015_v55  }
 0x2b3   : > { %v997_v60 = vpop.permute.xlu1 %996 }
 0x2b4   : > { %v1000_v0 = vpop.permute.xlu0 %999  ;;  %v1022_v7 = vrot.slane %v997_v60, %v2330_v43  ;;  %v1071_v49 = vmul.f32 %v997_v60, %v2251_v10 }
 0x2b5   : > { %v1026_v2 = vrot.slane %v1000_v0, %v2330_v43  ;;  %v1072_v48 = vmul.f32 %v1000_v0, %v2257_v11 }
 0x2b6   : > { %v1079_v54 = vsel %vm509_vm0, %v1071_v49, 0.0 }
 0x2b7   : > { %v1003_v61 = vpop.permute.xlu1 %1002  ;;  %v1051_v24 = vsel %vm903_vm2, %v1026_v2, %v1022_v7  ;;  %v1086_v53 = vsel %vm509_vm0, %v1072_v48, 0.0  ;;  %v1080_v60 = vrot.slane %v1079_v54, 4 }
 0x2b8   : > { %v1030_v8 = vrot.slane %v1003_v61, %v2330_v43  ;;  %v1073_v50 = vmul.f32 %v1003_v61, %v2263_v13  ;;  %v1087_v59 = vrot.slane %v1086_v53, 4 }
 0x2ba   : > { %v1052_v26 = vsel %vm905_vm3, %v1030_v8, %v1051_v24  ;;  %v1093_v55 = vsel %vm509_vm0, %v1073_v50, 0.0 }
 0x2bb   : > { %v1006_v62 = vpop.permute.xlu1 %1005 }
 0x2bc   : > { %v1034_v9 = vrot.slane %v1006_v62, %v2330_v43  ;;  %v1074_v21 = vmul.f32 %v1006_v62, %v2273_v14 }
 0x2be   : > { %v1053_v28 = vsel %vm907_vm4, %v1034_v9, %v1052_v26  ;;  %v1100_v56 = vsel %vm509_vm0, %v1074_v21, 0.0  ;;  %v1088_v9 = vadd.f32 %v1087_v59, %v1086_v53 }
 0x2bf   : > { %v1009_v63 = vpop.permute.xlu1 %1008  ;;  %v1101_v0 = vrot.slane %v1100_v56, 4 }
 0x2c0   : > { %v1038_v19 = vrot.slane %v1009_v63, %v2330_v43  ;;  %v1075_v51 = vmul.f32 %v1009_v63, %v2276_v15  ;;  %v1094_v63 = vrot.slane %v1093_v55, 4 }
 0x2c2   : > { %v1054_v30 = vsel %vm909_vm5, %v1038_v19, %v1053_v28  ;;  %v1107_v61 = vsel %vm509_vm0, %v1075_v51, 0.0  ;;  %v1081_v19 = vadd.f32 %v1080_v60, %v1079_v54  ;;  %v1095_v24 = vadd.f32 %v1094_v63, %v1093_v55 }
 0x2c3   : > { %v1012_v1 = vpop.permute.xlu1 %1011  ;;  %v1108_v7 = vrot.slane %v1107_v61, 4 }
 0x2c4   : > { %v1042_v25 = vrot.slane %v1012_v1, %v2330_v43  ;;  %v1076_v52 = vmul.f32 %v1012_v1, %v2285_v16 }
 0x2c6   : > { %v1055_v35 = vsel %vm911_vm6, %v1042_v25, %v1054_v30  ;;  %v1114_v62 = vsel %vm509_vm0, %v1076_v52, 0.0 }
 0x2c7   : > { %v1015_v22 = vpop.permute.xlu1 %1014  ;;  %v1115_v8 = vrot.slane %v1114_v62, 4 }
 0x2c8   : > { %v1046_v27 = vrot.slane %v1015_v22, %v2330_v43  ;;  %v1077_v57 = vmul.f32 %v1015_v22, %v2287_v17  ;;  %v1102_v22 = vadd.f32 %v1101_v0, %v1100_v56 }
 0x2c9   : > { %v1116_v28 = vadd.f32 %v1115_v8, %v1114_v62 }
 0x2ca   : > { %v1056_v36 = vsel %vm913_vm7, %v1046_v27, %v1055_v35  ;;  %v1121_v1 = vsel %vm509_vm0, %v1077_v57, 0.0  ;;  %v1109_v27 = vadd.f32 %v1108_v7, %v1107_v61  ;;  %v1096_v35 = vrot.slane %v1095_v24, 2 }
 0x2cb   : > { %v1018_v31 = vpop.permute.xlu1 %1017  ;;  %v1122_v25 = vrot.slane %v1121_v1, 4  ;;  %v1117_v41 = vrot.slane %v1116_v28, 2 }
 0x2cc   : > { %v1050_v32 = vrot.slane %v1018_v31, %v2330_v43  ;;  %v1078_v58 = vmul.f32 %v1018_v31, %v2293_v18  ;;  %v1089_v31 = vrot.slane %v1088_v9, 2  ;;  %v1110_v40 = vrot.slane %v1109_v27, 2 }
 0x2cd   : > { %v1097_v45 = vadd.f32 %v1096_v35, %v1095_v24  ;;  %v1118_v21 = vadd.f32 %v1117_v41, %v1116_v28 }
 0x2ce   : > { %v1057_v37 = vsel %vm915_vm8, %v1050_v32, %v1056_v36  ;;  %v1128_v2 = vsel %vm509_vm0, %v1078_v58, 0.0  ;;  %v1082_v32 = vrot.slane %v1081_v19, 2  ;;  %v1103_v36 = vrot.slane %v1102_v22, 2 }
 0x2cf   : > { %v1059_v39 = vsel %vm918_vm9, %v1057_v37, 0.0  ;;  %v1129_v26 = vrot.slane %v1128_v2, 4  ;;  %v1123_v37 = vadd.f32 %v1122_v25, %v1121_v1  ;;  %v1090_v42 = vadd.f32 %v1089_v31, %v1088_v9 }
 0x2d0   : > { %1060 = vadd.xlane.f32.xlu1 %v1059_v39  ;;  %v1083_v44 = vadd.f32 %v1082_v32, %v1081_v19  ;;  %v1111_v50 = vadd.f32 %v1110_v40, %v1109_v27  ;;  %v1098_v53 = vrot.slane %v1097_v45, 1  ;;  %v1119_v58 = vrot.slane %v1118_v21, 1 }
 0x2d1   : > { %v1130_v39 = vadd.f32 %v1129_v26, %v1128_v2  ;;  %v1124_v48 = vrot.slane %v1123_v37, 2  ;;  %v1091_v51 = vrot.slane %v1090_v42, 1 }
 0x2d2   : > { %v1084_v52 = vrot.slane %v1083_v44, 1  ;;  %v1112_v57 = vrot.slane %v1111_v50, 1  ;;  %v1099_v62 = vadd.f32 %v1098_v53, %v1097_v45  ;;  %v1120_v24 = vadd.f32 %v1119_v58, %v1118_v21 }
 0x2d3   : > { %v1131_v49 = vrot.slane %v1130_v39, 2  ;;  %v1125_v55 = vadd.f32 %v1124_v48, %v1123_v37  ;;  %v1092_v59 = vadd.f32 %v1091_v51, %v1090_v42 }
 0x2d4   : > { %v1085_v60 = vadd.f32 %v1084_v52, %v1083_v44  ;;  %v1113_v19 = vadd.f32 %v1112_v57, %v1111_v50  ;;  %v1160_v57 = vld [vmem:[%s2650_s6 + $0x8] sm:$0xff] }
 0x2d5   : > { %v1132_v56 = vadd.f32 %v1131_v49, %v1130_v39  ;;  %v1126_v0 = vrot.slane %v1125_v55, 1 }
 0x2d7   : > { %v1133_v1 = vrot.slane %v1132_v56, 1  ;;  %v1127_v31 = vadd.f32 %v1126_v0, %v1125_v55  ;;  %v1836_v0 = vld [vmem:[%s2652_s8] ss:$0 sm:$0xff] }
 0x2d9   : > { %v1134_v32 = vadd.f32 %v1133_v1, %v1132_v56 }
 0x2ef   : > { %v2423_v46 = vpop.f32.mrf.mxu1 }
 0x2f1   : > { %v1935_v47 = vpop.f32.mrf.mxu1 }
 0x2f2   : > { %v1104_v47 = vadd.f32 %v1103_v36, %v1102_v22  ;;  %v1429_v36 = vpop.permute.xlu0 %1428 }
 0x2f3   : > { %v1431_v44 = vadd.f32 %v1429_v36, %v2423_v46 }
 0x2f4   : > { %v1105_v54 = vrot.slane %v1104_v47, 1 }
 0x2f5   : > { %1433 = vrot.lane.b32.xlu0 %v1431_v44, %s2090_s18 }
 0x2f6   : > { %v1106_v63 = vadd.f32 %v1105_v54, %v1104_v47 }
 0x359   : > { %v1061_v30 = vpop.xlane.xlu1 %1060 }
 0x35a   : > { %2016 = vrcp.f32 %v1061_v30 }
 0x367   : > { %v2017_v61 = vpop.eup %2016 }
 0x368   : > { %v1136_v2 = vrot.slane %v2017_v61, 1  ;;  %v1137_v7 = vrot.slane %v2017_v61, 2  ;;  %v1138_v8 = vrot.slane %v2017_v61, 3  ;;  %v1139_v9 = vrot.slane %v2017_v61, 4 }
 0x369   : > { %v1140_v22 = vrot.slane %v2017_v61, 5  ;;  %v1141_v25 = vrot.slane %v2017_v61, 6  ;;  %v1142_v26 = vrot.slane %v2017_v61, 7  ;;  %v2449_v37 = vmul.f32 %v2017_v61, %v1085_v60  ;;  %v2487_v60 = vld [vmem:[%s473_s25] sm:$0xff] }
 0x36a   : > { %v2441_v27 = vmul.f32 %v1136_v2, %v1092_v59  ;;  %v2443_v28 = vmul.f32 %v1137_v7, %v1099_v62  ;;  %v2445_v30 = vmul.f32 %v1138_v8, %v1106_v63  ;;  %v2447_v35 = vmul.f32 %v1139_v9, %v1113_v19  ;;  %v1159_v59 = vld [vmem:[%s2650_s6] sm:$0xff] }
 0x36b   : > { %v2451_v39 = vmul.f32 %v1140_v22, %v1120_v24  ;;  %v2455_v42 = vmul.f32 %v1141_v25, %v1127_v31  ;;  %v2458_v45 = vmul.f32 %v1142_v26, %v1134_v32  ;;  %v1434_v24 = vpop.permute.xlu0 %1433 }
 0x36c   : > { %v1173_v40 = vrot.slane %v2441_v27, 7  ;;  %v1175_v41 = vrot.slane %v2443_v28, 6  ;;  %v1177_v48 = vrot.slane %v2445_v30, 5  ;;  %v1179_v50 = vrot.slane %v2447_v35, 4 }
 0x36d   : > { %v1181_v51 = vrot.slane %v2451_v39, 3  ;;  %v1183_v53 = vrot.slane %v2455_v42, 2  ;;  %v1185_v55 = vrot.slane %v2458_v45, 1 }
 0x36e   : > { %v1174_v47 = vsel %vm903_vm2, %v1173_v40, %v2449_v37 }
 0x36f   : > { %v1176_v49 = vsel %vm905_vm3, %v1175_v41, %v1174_v47 }
 0x370   : > { %v1178_v21 = vsel %vm907_vm4, %v1177_v48, %v1176_v49 }
 0x371   : > { %v1180_v52 = vsel %vm909_vm5, %v1179_v50, %v1178_v21 }
 0x372   : > { %v1182_v54 = vsel %vm911_vm6, %v1181_v51, %v1180_v52 }
 0x373   : > { %v1184_v56 = vsel %vm913_vm7, %v1183_v53, %v1182_v54 }
 0x374   : > { %v1186_v58 = vsel %vm915_vm8, %v1185_v55, %v1184_v56 }
 0x375   : > { %1916 = vmatmul.mubr.msk.f32.vlgmr.msra.gmra.mxu0 %vm509_vm0, %v1186_v58 }
 0x376   : > { %1919 = vmatpush3.msra.mxu0 %v1160_v57  ;;  %1922 = vmatprep.mubr.msk.f32.mxu0 %vm2087_vm1, %v2086_v4 }
 0x377   : > { %1920 = vmatprep.subr.mxu0 %v2086_v4 }
 0x378   : > { %1921 = vmatpush3.msra.mxu0 %v1159_v59 }
 0x379   : > { %1923 = vmatmul.mubr.msk.f32.vlgmr.msra.gmra.mxu0 %vm1259_vm10, %v2487_v60 }
 0x435   : > { %v1255_v61 = vpop.f32.mrf.mxu0 }
 0x437   : > { %v1917_v62 = vpop.f32.mrf.mxu0 }
 0x439   : > { %v1329_v63 = vpop.f32.mrf.mxu0 }
 0x43a   : > { %v1330_v1 = vadd.f32 %v1329_v63, %v1255_v61 }
 0x43b   : > { %v1924_v2 = vpop.f32.mrf.mxu0 }
 0x43c   : > { %v1340_v7 = vadd.f32 %v1836_v0, %v1330_v1 }
 0x43e   : > { %v1415_v8 = vadd.f32 %v2423_v46, %v1340_v7  ;;  %v2503_v46 = vld [vmem:[%s2654_s10] ss:$0 sm:$0xff] }
 0x440   : > { %v1838_v9 = vmul.f32 -1.442695, %v1415_v8 }
 0x442   : > { %2018 = vpow2.f32 %v1838_v9  ;;  %v1523_v9 = vmul.f32 %v2503_v46, %v2251_v10  ;;  %v1526_v10 = vmul.f32 %v2503_v46, %v2273_v14 }
 0x44f   : > { %v2019_v19 = vpop.eup %2018 }
 0x450   : > { %v1419_v4 = vadd.f32 1.0, %v2019_v19 }
 0x452   : > { %2020 = vrcp.f32 %v1419_v4  ;;  %v1531_v4 = vsel %vm509_vm0, %v1523_v9, 0.0 }
 0x45f   : > { %v2021_v22 = vpop.eup %2020 }
 0x460   : > { %v1436_v25 = vmul.f32 %v2021_v22, %v1434_v24  ;;  %v1443_v40 = vsub.f32 1.0, %v2021_v22  ;;  %v1524_v24 = vmul.f32 %v2503_v46, %v2257_v11 }
 0x462   : > { %1438 = vrot.lane.b32.xlu0 %v1436_v25, %s2090_s18  ;;  %v1525_v25 = vmul.f32 %v2503_v46, %v2263_v13  ;;  %s2659_s18 = sand.u32 1, %s2076_s28  }
 0x463   : > { %s1817_s25 = sshll.u32 %s2659_s18, 3  ;;  %s2598_s18 = scalar_lea.hbm %s2657_s13, %s1843_s26 }
 0x464   : > { %s469_s17 = scalar_lea.vmem [#allocation3], %s1817_s25  ;;  %s2093_s26 = smov [#allocation3]  }
 0x465   : > { %s1706_s14 = sshll.u32 %s469_s17, 4  ;;  %s2028_s16 = sshll.u32 %s2093_s26, 4  ;;  %s2600_s14 = int_to_ptr.vmem [resolvable:$true] %s1706_s14  ;;  %s2029_s16 = int_to_ptr.vmem [resolvable:$false] %s2028_s16 }
 0x466   : > { %1449 = vrot.lane.b32.xlu0 %v2261_v12, %s2091_s21  ;;  %s2024_s25 = scalar_lea.vmem %s2600_s14, 128  ;;  %p2031_p1 = scmp.lt.s32.totalorder %s2600_s14, %s2029_s16 }
 0x467   : > { %p2025_p12 = scmp.ne.s32.totalorder %s2600_s14, %s2024_s25 }
 0x469   : > { %p2026_p13 = pnand %p2025_p12, %p2205_p5 }
 0x46b   : > { %p2027_p0 = pneg %p2026_p13 }
 0x4d4   : > { %v1439_v26 = vpop.permute.xlu0 %1438 }
 0x4d5   : > { %v1441_v31 = vadd.f32 %v1439_v26, %v1340_v7  ;;  %v1540_v26 = vsel %vm509_vm0, %v1526_v10, 0.0 }
 0x4d7   : > { %2022 = vtanh.f32 %v1441_v31  ;;  %v1527_v31 = vmul.f32 %v2503_v46, %v2276_v15 }
 0x4d8   : > { %v1450_v36 = vpop.permute.xlu0 %1449 }
 0x4d9   : > { %v1452_v44 = vmul.f32 %v2021_v22, %v1450_v36  ;;  %v1534_v22 = vsel %vm509_vm0, %v1524_v24, 0.0  ;;  %v1543_v11 = vsel %vm509_vm0, %v1527_v31, 0.0  ;;  %v1529_v36 = vmul.f32 %v2503_v46, %v2287_v17 }
 0x4db   : > { %v1549_v14 = vsel %vm509_vm0, %v1529_v36, 0.0 }
 0x4e4   : > { %v2023_v32 = vpop.eup %2022 }
 0x4e5   : > { %1445 = vrot.lane.b32.xlu0 %v2023_v32, %s2092_s22  ;;  %v1528_v32 = vmul.f32 %v2503_v46, %v2285_v16  ;;  %v1841_v16 = vld [vmem:[#allocation2] ss:$0 sm:$0xff] }
 0x4e7   : > { %v1546_v13 = vsel %vm509_vm0, %v1528_v32, 0.0 }
 0x4e9   : > { %1460 = vrot.lane.b32.xlu0 %v2503_v46, %s2092_s22 }
 0x557   : > { %v1446_v41 = vpop.permute.xlu0 %1445 }
 0x558   : > { %v1448_v12 = vmul.f32 %v1446_v41, %v1443_v40  ;;  %v1530_v40 = vmul.f32 %v2503_v46, %v2293_v18 }
 0x55a   : > { %v2507_v47 = vadd.f32 %v1452_v44, %v1448_v12  ;;  %v1552_v15 = vsel %vm509_vm0, %v1530_v40, 0.0 }
 0x55b   : > { %v1461_v48 = vpop.permute.xlu0 %1460 }
 0x55c   : > { %v1497_v49 = vmul.f32 %v1461_v48, %v2507_v47  ;;  %v1464_v50 = vmul.f32 %v1461_v48, %v2441_v27  ;;  %v1465_v21 = vmul.f32 %v1461_v48, %v2443_v28  ;;  %v1466_v51 = vmul.f32 %v1461_v48, %v2445_v30 }
 0x55d   : > { %v1467_v52 = vmul.f32 %v1461_v48, %v2447_v35  ;;  %v1463_v53 = vmul.f32 %v1461_v48, %v2449_v37  ;;  %v1468_v54 = vmul.f32 %v1461_v48, %v2451_v39  ;;  %v1469_v57 = vmul.f32 %v1461_v48, %v2455_v42 }
 0x55e   : > { %1499 = vrot.lane.b32.xlu0 %v1497_v49, %s2092_s22  ;;  %v1479_v55 = vrot.slane %v1464_v50, 7  ;;  %v1481_v56 = vrot.slane %v1465_v21, 6  ;;  %v1470_v58 = vmul.f32 %v1461_v48, %v2458_v45  ;;  %v1483_v59 = vrot.slane %v1466_v51, 5 }
 0x55f   : > { %v1485_v30 = vrot.slane %v1467_v52, 4  ;;  %v1487_v37 = vrot.slane %v1468_v54, 3  ;;  %v1489_v61 = vrot.slane %v1469_v57, 2 }
 0x560   : > { %v1480_v27 = vsel %vm903_vm2, %v1479_v55, %v1463_v53  ;;  %v1491_v42 = vrot.slane %v1470_v58, 1 }
 0x561   : > { %v1482_v28 = vsel %vm905_vm3, %v1481_v56, %v1480_v27 }
 0x562   : > { %1506 = vrot.lane.b32.xlu0 %v2503_v46, %s2091_s21  ;;  %v1484_v35 = vsel %vm907_vm4, %v1483_v59, %v1482_v28  ;;  %s2030_s21 = scalar_lea.vmem %s2029_s16, 256 }
 0x563   : > { %v1486_v39 = vsel %vm909_vm5, %v1485_v30, %v1484_v35  ;;  %p2032_p2 = scmp.lt.s32.totalorder %s2030_s21, %s2024_s25 }
 0x564   : > { %v1488_v62 = vsel %vm911_vm6, %v1487_v37, %v1486_v39 }
 0x565   : > { %v1490_v45 = vsel %vm913_vm7, %v1489_v61, %v1488_v62  ;;  %p2033_p3 = por %p2032_p2, %p2031_p1 }
 0x566   : > { %v1492_v63 = vsel %vm915_vm8, %v1491_v42, %v1490_v45 }
 0x567   : > { %v1494_v0 = vsel %vm509_vm0, %v1492_v63, 0.0  ;;  %p2034_p4 = pnand %p2033_p3, %p2027_p0 }
 0x568   : > { %1495 = vadd.xlane.f32.xlu1 %v1494_v0 }
 0x5d0   : > { %v1500_v1 = vpop.permute.xlu0 %1499 }
 0x5d1   : > { %v1502_v2 = vsel %vm509_vm0, %v1500_v1, 0.0 }
 0x5d2   : > { %1503 = vadd.xlane.f32.xlu0 %v1502_v2 }
 0x5d4   : > { %v1507_v7 = vpop.permute.xlu0 %1506 }
 0x5d5   : > { %v1509_v8 = vmul.f32 %v1507_v7, %v2487_v60  ;;  %v1537_v60 = vsel %vm509_vm0, %v1525_v25, 0.0 }
 0x5d7   : > { %v1510_v19 = vsel %vm1259_vm10, %v1509_v8, 0.0 }
 0x5d8   : > { %1511 = vadd.xlane.f32.xlu1 %v1510_v19 }
 0x5dc   : > { %1532 = vadd.xlane.f32.xlu1 %v1531_v4 }
 0x5e0   : > { %1535 = vadd.xlane.f32.xlu1 %v1534_v22 }
 0x5e4   : > { %1538 = vadd.xlane.f32.xlu1 %v1537_v60 }
 0x5e8   : > { %1541 = vadd.xlane.f32.xlu1 %v1540_v26 }
 0x5ec   : > { %1544 = vadd.xlane.f32.xlu1 %v1543_v11 }
 0x5f0   : > { %1547 = vadd.xlane.f32.xlu1 %v1546_v13 }
 0x5f1   : > { %v1496_v41 = vpop.xlane.xlu1 %1495 }
 0x5f4   : > { %1550 = vadd.xlane.f32.xlu1 %v1549_v14 }
 0x5f8   : > { %1553 = vadd.xlane.f32.xlu1 %v1552_v15 }
 0x65b   : > { %v1504_v44 = vpop.xlane.xlu0 %1503 }
 0x65c   : > { %v1505_v12 = vadd.f32 %v1504_v44, %v1496_v41 }
 0x661   : > { %v1512_v48 = vpop.xlane.xlu1 %1511 }
 0x662   : > { %v1513_v49 = vadd.f32 %v1512_v48, %v1505_v12 }
 0x664   : > { %v1521_v50 = vadd.f32 %v1841_v16, %v1513_v49 }
 0x665   : > { %v1533_v21 = vpop.xlane.xlu1 %1532 }
 0x666   : > { %1557 = vperm.xlu0 %1983, %v1521_v50  }
 0x669   : > { %v1536_v17 = vpop.xlane.xlu1 %1535 }
 0x66d   : > { %v1539_v51 = vpop.xlane.xlu1 %1538 }
 0x671   : > { %v1542_v52 = vpop.xlane.xlu1 %1541 }
 0x675   : > { %v1545_v53 = vpop.xlane.xlu1 %1544 }
 0x679   : > { %v1548_v54 = vpop.xlane.xlu1 %1547 }
 0x67d   : > { %v1551_v59 = vpop.xlane.xlu1 %1550 }
 0x681   : > { %v1554_v39 = vpop.xlane.xlu1 %1553 }
 0x6e1   : > { %v1558_v55 = vpop.permute.xlu0 %1557 }
 0x6e2   : > { %v1562_v18 = vrot.slane %v1558_v55, %v2307_v33  ;;  %v1566_v46 = vrot.slane %v1558_v55, %v929_v3  ;;  %v1570_v58 = vrot.slane %v1558_v55, %v933_v5  ;;  %v1574_v27 = vrot.slane %v1558_v55, %v937_v6 }
 0x6e3   : > { %v1578_v35 = vrot.slane %v1558_v55, %v941_v20  ;;  %v1582_v33 = vrot.slane %v1558_v55, %v945_v29  ;;  %v1590_v3 = vrot.slane %v1558_v55, %v953_v38  ;;  %v1586_v6 = vrot.slane %v1558_v55, %v949_v34 }
 0x6e4   : > { %v1599_v56 = vadd.f32 %v1562_v18, %v1533_v21  ;;  %v1600_v57 = vadd.f32 %v1566_v46, %v1536_v17  ;;  %v1601_v28 = vadd.f32 %v1570_v58, %v1539_v51  ;;  %v1602_v30 = vadd.f32 %v1574_v27, %v1542_v52 }
 0x6e5   : > { %v1603_v5 = vadd.f32 %v1578_v35, %v1545_v53  ;;  %v1604_v37 = vadd.f32 %v1582_v33, %v1548_v54  ;;  %v1606_v61 = vadd.f32 %v1590_v3, %v1554_v39  ;;  %v1605_v20 = vadd.f32 %v1586_v6, %v1551_v59 }
 0x6e6   : > { %1616 = vperm.xlu1 %1982, %v1599_v56   ;;  %1619 = vperm.xlu0 %1983, %v1600_v57  }
 0x6ea   : > { %1622 = vperm.xlu1 %1982, %v1601_v28   ;;  %1625 = vperm.xlu0 %1983, %v1602_v30  }
 0x6ee   : > { %1628 = vperm.xlu1 %1982, %v1603_v5   ;;  %1631 = vperm.xlu0 %1983, %v1604_v37  }
 0x6f2   : > { %1634 = vperm.xlu1 %1982, %v1605_v20   ;;  %1637 = vperm.xlu0 %1983, %v1606_v61  }
 0x6f6   : > { %1681 = vrot.lane.b32.xlu1 %v2507_v47, %s2092_s22  ;;  %s487_s22 = scalar_lea.vmem %s2656_s12, %s2248_s29  ;;  %s2664_s29 = sand.u32 1, %s2076_s28  }
 0x6f7   : > { %s1690_s11 = scalar_lea.sflag [#allocation4], %s2664_s29 }
 0x761   : > { %v1620_v29 = vpop.permute.xlu0 %1619  ;;  %v1617_v62 = vpop.permute.xlu1 %1616 }
 0x762   : > { %v1646_v38 = vrot.slane %v1620_v29, %v2330_v43  ;;  %v1642_v42 = vrot.slane %v1617_v62, %v2330_v43 }
 0x764   : > { %v1671_v63 = vsel %vm903_vm2, %v1646_v38, %v1642_v42 }
 0x765   : > { %v1626_v23 = vpop.permute.xlu0 %1625  ;;  %v1623_v34 = vpop.permute.xlu1 %1622 }
 0x766   : > { %v1650_v45 = vrot.slane %v1623_v34, %v2330_v43  ;;  %v1654_v0 = vrot.slane %v1626_v23, %v2330_v43 }
 0x768   : > { %v1672_v47 = vsel %vm905_vm3, %v1650_v45, %v1671_v63 }
 0x769   : > { %v1632_v1 = vpop.permute.xlu0 %1631  ;;  %v1629_v2 = vpop.permute.xlu1 %1628  ;;  %v1673_v9 = vsel %vm907_vm4, %v1654_v0, %v1672_v47 }
 0x76a   : > { %v1658_v7 = vrot.slane %v1629_v2, %v2330_v43  ;;  %v1662_v8 = vrot.slane %v1632_v1, %v2330_v43 }
 0x76c   : > { %v1674_v19 = vsel %vm909_vm5, %v1658_v7, %v1673_v9 }
 0x76d   : > { %v1638_v4 = vpop.permute.xlu0 %1637  ;;  %v1635_v24 = vpop.permute.xlu1 %1634  ;;  %v1675_v60 = vsel %vm911_vm6, %v1662_v8, %v1674_v19 }
 0x76e   : > { %v1670_v22 = vrot.slane %v1638_v4, %v2330_v43  ;;  %v1666_v25 = vrot.slane %v1635_v24, %v2330_v43 }
 0x770   : > { %v1676_v10 = vsel %vm913_vm7, %v1666_v25, %v1675_v60 }
 0x771   : > { %v1677_v43 = vsel %vm915_vm8, %v1670_v22, %v1676_v10  ;;  %v1682_v26 = vpop.permute.xlu1 %1681 }
 0x772   : > { %1679 = vst.msk [vmem:[%s487_s22] sm:$0xff] %vm918_vm9, %v1677_v43 }
 0x773   : > { %1684 = vst.msk [vmem:[%s469_s17] sm:$0xff] %vm509_vm0, %v1682_v26 }
 0x774   : > { %2037 = shalt.err (!%p2034_p4)
}
 0x775   : > { %s2038_s17 = scalar_lea.hbm %s2598_s18, 128  ;;  %s2042_s24 = scalar_lea.hbm %s2657_s13, 256 }
 0x776   : > { %p2039_p7 = scmp.ne.s32.totalorder %s2598_s18, %s2038_s17  ;;  %p2043_p10 = scmp.lt.s32.totalorder %s2598_s18, %s2657_s13 }
 0x777   : > { %p2044_p11 = scmp.lt.s32.totalorder %s2042_s24, %s2038_s17 }
 0x778   : > { %p2040_p8 = pnand %p2039_p7, %p2205_p5 }
 0x779   : > { %p2045_p12 = por %p2044_p11, %p2043_p10 }
 0x77a   : > { %p2041_p9 = pneg %p2040_p8 }
 0x77c   : > { %p2046_p13 = pnand %p2045_p12, %p2041_p9 }
 0x77e   : > { %2049 = shalt.err (!%p2046_p13)
}
 0x77f   : > { %1936 = dma.vmem_to_hbm [thread:$0]  (%p2205_p5), %s2600_s14, 128, %s2598_s18, %s1690_s11  }
 0x780 PF: > { %p1942_p0 = scmp.ge.s32.totalorder %s2084_s30, 2  ;;  %s1725_s25 = sand.u32 1, %s2072_s27  }
 0x781   : > { %s1726_s16 = scalar_lea.sflag [#allocation4], %s1725_s25 }
 0x782   : > { %p1939_p1 = pnand %p1942_p0, %p2209_p6 }
 0x784   : > { %p1940_p2 = pneg %p1939_p1 }
 0x786   : > { %2067 = dma.done.wait (%p1940_p2), %s1726_s16, 128  }
 0x787   : > { %2069 = vsyncadd (%p1940_p2), %s1726_s16, 4294967168  ;;  %s2665_s21 = sld [smem:[#allocation6_spill]]  ;;  %p26_p3 = scmp.ge.s32.totalorder %s2192_s15, 4  }
 0x788   : > { %s2666_s29 = sld [smem:[#allocation7_spill]]  ;;  %s2667_s27 = smov %s2076_s28 }
 0x789   : > { %s2669_s30 = smov %s2192_s15  ;;  %28 = sbr.rel (!%p26_p3) target bundleno = 6 (0x6), region = 121 }
 0x78d   : > { %s2668_s28 = smov %s2665_s21 }
 0x78e   :  { %1731 = vsyncpa [#allocation4], 1 }
 0x78f   :  { %1733 = vsyncpa [#allocation4 + $0x1], 1 }

</bundles_post_ra>
